<compile_context>
chip_gen: v7x
topology: tpu7x:2x2x1
jax: 0.10.0
libtpu: 0.0.40
codegen_flags: <defaults>
</compile_context>

<pallas_src>
import functools

import jax
import jax.numpy as jnp
from jax import lax
from jax.experimental import pallas as pl
from jax.experimental.pallas import tpu as pltpu


def _round_up(x, m):
    return ((x + m - 1) // m) * m


def _ctrnn_kernel(xh_ref, xo_ref, t_ref,
                  wu_ref, bu_ref, wode_ref, woi_ref, bo_ref,
                  out_ref, *, n_steps, unroll):
    """Fused jump-update + Euler ODE flow for one batch tile."""
    # ---- forward_update: h = tanh([x, h] @ W_u + b_u) -- single MXU call ----
    pre = (jnp.dot(xh_ref[...], wu_ref[...],
                   preferred_element_type=jnp.float32)
           + bu_ref[...])
    h = jnp.tanh(pre)                                   # f32 [TB, Hp]

    # ---- forward_ode: explicit Euler flow from t0 -> t1 ----------------------
    # TODO(synk): forward_ode is abstract in _CTRNNBase; adaptive torchdiffeq
    # solvers have no static Pallas form, so a fixed-step Euler flow is used.
    t0 = t_ref[:, 0:1]
    t1 = t_ref[:, 1:2]
    dt = (t1 - t0) * (1.0 / float(n_steps))             # [TB, 1]
    dt_b = jnp.broadcast_to(dt, h.shape)                # hoisted broadcast
    wode = wode_ref[...]                                # hoisted weight load
    xo_proj = (jnp.dot(xo_ref[...], woi_ref[...],       # constant over the flow
                       preferred_element_type=jnp.float32)
               + bo_ref[...])

    def body(_, hh):
        dh = jnp.tanh(
            jnp.dot(hh.astype(wode.dtype), wode,        # bf16 MXU feed
                    preferred_element_type=jnp.float32)
            + xo_proj)
        return hh + dt_b * dh                           # f32 state update

    h = lax.fori_loop(0, n_steps, body, h, unroll=unroll)
    out_ref[...] = h.astype(out_ref.dtype)


def prepare_ctrnn_params(params, lane_pad=128, weight_dtype=jnp.bfloat16):
    """One-time parameter prep: transpose, stack W_ih/W_hh, pad to lane-dense
    Hp (multiple of 128), cast matmul weights to bf16 (biases stay f32)."""
    w_ih, w_hh, b_u, w_ode, w_oi, b_o = params
    H = w_hh.shape[0]
    Hp = _round_up(H, lane_pad)
    ph = Hp - H

    # Fused jump-update weight: rows = [Din | H | zero-pad], cols = Hp.
    wu = jnp.concatenate([jnp.transpose(w_ih), jnp.transpose(w_hh)],
                         axis=0).astype(jnp.float32)
    wu = jnp.pad(wu, ((0, ph), (0, ph)))
    wode = jnp.pad(jnp.transpose(w_ode).astype(jnp.float32), ((0, ph), (0, ph)))
    woi = jnp.pad(jnp.transpose(w_oi).astype(jnp.float32), ((0, 0), (0, ph)))
    bu = jnp.pad(b_u.astype(jnp.float32), (0, ph)).reshape(1, Hp)
    bo = jnp.pad(b_o.astype(jnp.float32), (0, ph)).reshape(1, Hp)

    return dict(
        wu=wu.astype(weight_dtype),
        wode=wode.astype(weight_dtype),
        woi=woi.astype(weight_dtype),
        bu=bu, bo=bo, H=H, Hp=Hp)


def ctrnn_forward(input_update, hidden, times, input_ode, prepared,
                  n_intermediate=0):
    """Batch-tiled fused CTRNN forward (jump update + Euler ODE flow)."""
    B, H = hidden.shape
    Hp = int(prepared["Hp"])
    assert int(prepared["H"]) == H
    Din = input_update.shape[1]
    Dode = input_ode.shape[1]
    n_steps = int(n_intermediate) + 1
    unroll = n_steps if n_steps <= 8 else 8             # cap unroll (vreg pressure)

    act_dtype = prepared["wu"].dtype                    # bf16 MXU feed
    # Batch tile: multiple of 16 (bf16 sublane packing), lane-dense output.
    TB = min(128, _round_up(B, 16))
    Bp = _round_up(B, TB)
    pb = Bp - B

    # Per-call glue: pad hidden to Hp lanes (exact: zero weight rows/cols),
    # fuse [x, h] along the contraction axis, pad batch to a TB multiple.
    h_pad = jnp.pad(hidden.astype(jnp.float32), ((0, pb), (0, Hp - H)))
    x_pad = jnp.pad(input_update.astype(jnp.float32), ((0, pb), (0, 0)))
    xh = jnp.concatenate([x_pad, h_pad], axis=1).astype(act_dtype)  # [Bp, Din+Hp]
    xo = jnp.pad(input_ode.astype(jnp.float32),
                 ((0, pb), (0, 0))).astype(act_dtype)               # [Bp, Dode]
    tt = jnp.pad(times.astype(jnp.float32), ((0, pb), (0, 0)))      # [Bp, 2]

    wu, bu = prepared["wu"], prepared["bu"]
    wode, woi, bo = prepared["wode"], prepared["woi"], prepared["bo"]

    Kin = Din + Hp
    grid = (pl.cdiv(Bp, TB),)

    def batch_spec(feat):
        return pl.BlockSpec((TB, feat), lambda b: (b, 0))

    def resident_spec(shape):                           # weights: same block
        return pl.BlockSpec(shape, lambda b: (0, 0))    # every grid step

    # Advisory cost hint so XLA overlaps surrounding ops with this heavy call.
    flops = 2 * Bp * Kin * Hp + 2 * Bp * Dode * Hp + 2 * n_steps * Bp * Hp * Hp
    transc = (n_steps + 1) * Bp * Hp
    bytes_accessed = (xh.size * xh.dtype.itemsize + xo.size * xo.dtype.itemsize
                      + tt.size * 4 + wu.size * wu.dtype.itemsize
                      + wode.size * wode.dtype.itemsize
                      + woi.size * woi.dtype.itemsize
                      + bu.size * 4 + bo.size * 4 + Bp * Hp * 4)

    # Explicit VMEM budget: double-buffered activation tiles + resident weights
    # + headroom; keep well under v7x's 64 MiB physical VMEM.
    act_tile = (TB * Kin + TB * Dode) * xh.dtype.itemsize + TB * 2 * 4 + TB * Hp * 4
    wt_bytes = ((wu.size + wode.size + woi.size) * wu.dtype.itemsize
                + (bu.size + bo.size) * 4)
    vmem_limit = int(min(max(4 * (2 * act_tile + wt_bytes), 32 * 1024 * 1024),
                         48 * 1024 * 1024))

    out = pl.pallas_call(
        functools.partial(_ctrnn_kernel, n_steps=n_steps, unroll=unroll),
        out_shape=jax.ShapeDtypeStruct((Bp, Hp), jnp.float32),
        grid=grid,
        in_specs=[
            batch_spec(Kin),             # [x, h] fused input
            batch_spec(Dode),            # input_ode
            batch_spec(2),               # times (t0, t1)
            resident_spec(wu.shape),     # fused update weight
            resident_spec(bu.shape),     # update bias
            resident_spec(wode.shape),   # ODE recurrent weight
            resident_spec(woi.shape),    # ODE input weight
            resident_spec(bo.shape),     # ODE bias
        ],
        out_specs=batch_spec(Hp),
        compiler_params=pltpu.CompilerParams(
            dimension_semantics=("parallel",),
            vmem_limit_bytes=vmem_limit),
        cost_estimate=pl.CostEstimate(
            flops=int(flops),
            transcendentals=int(transc),
            bytes_accessed=int(bytes_accessed)),
    )(xh, xo, tt, wu, bu, wode, woi, bo)

    return out[:B, :H]


def _reference(input_update, hidden, times, input_ode, params, n_intermediate=0):
    """Pure-JAX f32 reference with identical semantics (PyTorch weight layout)."""
    w_ih, w_hh, b_u, w_ode, w_oi, b_o = params
    n_steps = int(n_intermediate) + 1
    h = jnp.tanh(input_update @ w_ih.T + hidden @ w_hh.T + b_u)
    dt = (times[:, 1:2] - times[:, 0:1]) / n_steps
    xo_proj = input_ode @ w_oi.T + b_o
    for _ in range(n_steps):
        h = h + dt * jnp.tanh(h @ w_ode.T + xo_proj)
    return h


if __name__ == "__main__":
    B, DIN, DODE, H = 8, 16, 8, 32
    N_INTERMEDIATE = 3

    key = jax.random.PRNGKey(0)
    ks = jax.random.split(key, 10)
    bound = 1.0 / jnp.sqrt(H)

    # Deterministic synthetic parameters (PyTorch-style [out, in] weight layout).
    w_ih = jax.random.uniform(ks[0], (H, DIN), jnp.float32, -bound, bound)
    w_hh = jax.random.uniform(ks[1], (H, H), jnp.float32, -bound, bound)
    b_u = jax.random.uniform(ks[2], (H,), jnp.float32, -bound, bound)
    w_ode = jax.random.uniform(ks[3], (H, H), jnp.float32, -bound, bound)
    w_oi = jax.random.uniform(ks[4], (H, DODE), jnp.float32, -bound, bound)
    b_o = jax.random.uniform(ks[5], (H,), jnp.float32, -bound, bound)
    params = (w_ih, w_hh, b_u, w_ode, w_oi, b_o)

    # Inputs.
    input_update = jax.random.normal(ks[6], (B, DIN), jnp.float32)
    hidden = jax.random.normal(ks[7], (B, H), jnp.float32)
    input_ode = jax.random.normal(ks[8], (B, DODE), jnp.float32)
    t0 = jax.random.uniform(ks[9], (B, 1), jnp.float32, 0.0, 1.0)
    times = jnp.concatenate([t0, t0 + 0.5], axis=1)   # [B, 2] -> (t0, t1)

    # One-time parameter preparation (transpose/stack/pad/cast), not per call.
    prepared = prepare_ctrnn_params(params)

    out = ctrnn_forward(input_update, hidden, times, input_ode, prepared,
                        n_intermediate=N_INTERMEDIATE)
    out = jax.block_until_ready(out)

    ref = _reference(input_update, hidden, times, input_ode, params,
                     n_intermediate=N_INTERMEDIATE)
    assert out.shape == (B, H)
    # bf16 MXU feeds (f32 accumulation / state) -> slightly looser tolerance.
    assert jnp.allclose(out, ref, rtol=2e-2, atol=2e-2), "mismatch vs reference"

    print("KERNEL_OK")
</pallas_src>

<mosaic_0001>
module attributes {stable_mosaic.version = 11 : i64} {
  func.func @_ctrnn_kernel(%arg0: i32, %arg1: memref<16x144xbf16, #tpu.memory_space<vmem>>, %arg2: memref<16x8xbf16, #tpu.memory_space<vmem>>, %arg3: memref<16x2xf32, #tpu.memory_space<vmem>>, %arg4: memref<144x128xbf16, #tpu.memory_space<vmem>>, %arg5: memref<1x128xf32, #tpu.memory_space<vmem>>, %arg6: memref<128x128xbf16, #tpu.memory_space<vmem>>, %arg7: memref<8x128xbf16, #tpu.memory_space<vmem>>, %arg8: memref<1x128xf32, #tpu.memory_space<vmem>>, %arg9: memref<16x128xf32, #tpu.memory_space<vmem>>) attributes {dimension_semantics = [#tpu.dimension_semantics<parallel>], iteration_bounds = array<i64: 1>, scalar_prefetch = 0 : i64, scratch_operands = 0 : i64, tpu.core_type = #tpu.core_type<tc>, window_params = [{transform_indices = @transform_0, window_bounds = array<i64: 16, 144>}, {transform_indices = @transform_1, window_bounds = array<i64: 16, 8>}, {transform_indices = @transform_2, window_bounds = array<i64: 16, 2>}, {pipeline_mode = #tpu.pipeline_mode<synchronous>, transform_indices = @transform_3, window_bounds = array<i64: 144, 128>}, {pipeline_mode = #tpu.pipeline_mode<synchronous>, transform_indices = @transform_4, window_bounds = array<i64: 1, 128>}, {pipeline_mode = #tpu.pipeline_mode<synchronous>, transform_indices = @transform_5, window_bounds = array<i64: 128, 128>}, {pipeline_mode = #tpu.pipeline_mode<synchronous>, transform_indices = @transform_6, window_bounds = array<i64: 8, 128>}, {pipeline_mode = #tpu.pipeline_mode<synchronous>, transform_indices = @transform_7, window_bounds = array<i64: 1, 128>}, {transform_indices = @transform_8, window_bounds = array<i64: 16, 128>}]} {
    %c0 = arith.constant 0 : index
    %c0_0 = arith.constant 0 : index
    %0 = vector.load %arg1[%c0, %c0_0] : memref<16x144xbf16, #tpu.memory_space<vmem>>, vector<16x144xbf16>
    %c0_1 = arith.constant 0 : index
    %c0_2 = arith.constant 0 : index
    %1 = vector.load %arg4[%c0_1, %c0_2] : memref<144x128xbf16, #tpu.memory_space<vmem>>, vector<144x128xbf16>
    %cst = arith.constant dense<0.000000e+00> : vector<16x128xf32>
    %2 = tpu.matmul %0, %1, %cst {dimension_numbers = #tpu.dot_dimension_numbers<[1], [0], [0], [1], [0, 0, 1, 1], [], []>} : vector<16x144xbf16>, vector<144x128xbf16>, vector<16x128xf32> -> vector<16x128xf32>
    %c0_3 = arith.constant 0 : index
    %c0_4 = arith.constant 0 : index
    %3 = vector.load %arg5[%c0_3, %c0_4] : memref<1x128xf32, #tpu.memory_space<vmem>>, vector<1x128xf32>
    %4 = vector.broadcast %3 : vector<1x128xf32> to vector<16x128xf32>
    %5 = arith.addf %2, %4 : vector<16x128xf32>
    %6 = math.tanh %5 : vector<16x128xf32>
    %c0_5 = arith.constant 0 : index
    %c0_6 = arith.constant 0 : index
    %7 = vector.load %arg3[%c0_5, %c0_6] : memref<16x2xf32, #tpu.memory_space<vmem>>, vector<16x1xf32>
    %c0_7 = arith.constant 0 : index
    %c1 = arith.constant 1 : index
    %8 = vector.load %arg3[%c0_7, %c1] : memref<16x2xf32, #tpu.memory_space<vmem>>, vector<16x1xf32>
    %9 = arith.subf %8, %7 : vector<16x1xf32>
    %cst_8 = arith.constant 2.500000e-01 : f32
    %10 = vector.broadcast %cst_8 : f32 to vector<16x1xf32>
    %11 = arith.mulf %9, %10 : vector<16x1xf32>
    %12 = vector.shape_cast %11 : vector<16x1xf32> to vector<16x1xf32>
    %13 = vector.broadcast %12 : vector<16x1xf32> to vector<16x128xf32>
    %c0_9 = arith.constant 0 : index
    %c0_10 = arith.constant 0 : index
    %14 = vector.load %arg6[%c0_9, %c0_10] : memref<128x128xbf16, #tpu.memory_space<vmem>>, vector<128x128xbf16>
    %c0_11 = arith.constant 0 : index
    %c0_12 = arith.constant 0 : index
    %15 = vector.load %arg2[%c0_11, %c0_12] : memref<16x8xbf16, #tpu.memory_space<vmem>>, vector<16x8xbf16>
    %c0_13 = arith.constant 0 : index
    %c0_14 = arith.constant 0 : index
    %16 = vector.load %arg7[%c0_13, %c0_14] : memref<8x128xbf16, #tpu.memory_space<vmem>>, vector<8x128xbf16>
    %cst_15 = arith.constant dense<0.000000e+00> : vector<16x128xf32>
    %17 = tpu.matmul %15, %16, %cst_15 {dimension_numbers = #tpu.dot_dimension_numbers<[1], [0], [0], [1], [0, 0, 1, 1], [], []>} : vector<16x8xbf16>, vector<8x128xbf16>, vector<16x128xf32> -> vector<16x128xf32>
    %c0_16 = arith.constant 0 : index
    %c0_17 = arith.constant 0 : index
    %18 = vector.load %arg8[%c0_16, %c0_17] : memref<1x128xf32, #tpu.memory_space<vmem>>, vector<1x128xf32>
    %19 = vector.broadcast %18 : vector<1x128xf32> to vector<16x128xf32>
    %20 = arith.addf %17, %19 : vector<16x128xf32>
    %c0_i32 = arith.constant 0 : i32
    %21 = arith.truncf %6 : vector<16x128xf32> to vector<16x128xbf16>
    %cst_18 = arith.constant dense<0.000000e+00> : vector<16x128xf32>
    %22 = tpu.matmul %21, %14, %cst_18 {dimension_numbers = #tpu.dot_dimension_numbers<[1], [0], [0], [1], [0, 0, 1, 1], [], []>} : vector<16x128xbf16>, vector<128x128xbf16>, vector<16x128xf32> -> vector<16x128xf32>
    %23 = arith.addf %22, %20 : vector<16x128xf32>
    %24 = math.tanh %23 : vector<16x128xf32>
    %25 = arith.mulf %13, %24 : vector<16x128xf32>
    %26 = arith.addf %6, %25 : vector<16x128xf32>
    %c1_i32 = arith.constant 1 : i32
    %27 = arith.truncf %26 : vector<16x128xf32> to vector<16x128xbf16>
    %cst_19 = arith.constant dense<0.000000e+00> : vector<16x128xf32>
    %28 = tpu.matmul %27, %14, %cst_19 {dimension_numbers = #tpu.dot_dimension_numbers<[1], [0], [0], [1], [0, 0, 1, 1], [], []>} : vector<16x128xbf16>, vector<128x128xbf16>, vector<16x128xf32> -> vector<16x128xf32>
    %29 = arith.addf %28, %20 : vector<16x128xf32>
    %30 = math.tanh %29 : vector<16x128xf32>
    %31 = arith.mulf %13, %30 : vector<16x128xf32>
    %32 = arith.addf %26, %31 : vector<16x128xf32>
    %c2_i32 = arith.constant 2 : i32
    %33 = arith.truncf %32 : vector<16x128xf32> to vector<16x128xbf16>
    %cst_20 = arith.constant dense<0.000000e+00> : vector<16x128xf32>
    %34 = tpu.matmul %33, %14, %cst_20 {dimension_numbers = #tpu.dot_dimension_numbers<[1], [0], [0], [1], [0, 0, 1, 1], [], []>} : vector<16x128xbf16>, vector<128x128xbf16>, vector<16x128xf32> -> vector<16x128xf32>
    %35 = arith.addf %34, %20 : vector<16x128xf32>
    %36 = math.tanh %35 : vector<16x128xf32>
    %37 = arith.mulf %13, %36 : vector<16x128xf32>
    %38 = arith.addf %32, %37 : vector<16x128xf32>
    %c3_i32 = arith.constant 3 : i32
    %39 = arith.truncf %38 : vector<16x128xf32> to vector<16x128xbf16>
    %cst_21 = arith.constant dense<0.000000e+00> : vector<16x128xf32>
    %40 = tpu.matmul %39, %14, %cst_21 {dimension_numbers = #tpu.dot_dimension_numbers<[1], [0], [0], [1], [0, 0, 1, 1], [], []>} : vector<16x128xbf16>, vector<128x128xbf16>, vector<16x128xf32> -> vector<16x128xf32>
    %41 = arith.addf %40, %20 : vector<16x128xf32>
    %42 = math.tanh %41 : vector<16x128xf32>
    %43 = arith.mulf %13, %42 : vector<16x128xf32>
    %44 = arith.addf %38, %43 : vector<16x128xf32>
    %c0_22 = arith.constant 0 : index
    %c0_23 = arith.constant 0 : index
    %45 = vector.load %arg9[%c0_22, %c0_23] : memref<16x128xf32, #tpu.memory_space<vmem>>, vector<16x128xf32>
    tpu.vector_store %arg9[%c0_22, %c0_23], %44 {strides = array<i32>} : memref<16x128xf32, #tpu.memory_space<vmem>>, vector<16x128xf32>,
    return
  }
  func.func @transform_0(%arg0: i32) -> (i32, i32) {
    %c0_i32 = arith.constant 0 : i32
    %c0_i32_0 = arith.constant 0 : i32
    return %arg0, %c0_i32 : i32, i32
  }
  func.func @transform_1(%arg0: i32) -> (i32, i32) {
    %c0_i32 = arith.constant 0 : i32
    %c0_i32_0 = arith.constant 0 : i32
    return %arg0, %c0_i32 : i32, i32
  }
  func.func @transform_2(%arg0: i32) -> (i32, i32) {
    %c0_i32 = arith.constant 0 : i32
    %c0_i32_0 = arith.constant 0 : i32
    return %arg0, %c0_i32 : i32, i32
  }
  func.func @transform_3(%arg0: i32) -> (i32, i32) {
    %c0_i32 = arith.constant 0 : i32
    %c0_i32_0 = arith.constant 0 : i32
    %c0_i32_1 = arith.constant 0 : i32
    return %c0_i32, %c0_i32_0 : i32, i32
  }
  func.func @transform_4(%arg0: i32) -> (i32, i32) {
    %c0_i32 = arith.constant 0 : i32
    %c0_i32_0 = arith.constant 0 : i32
    %c0_i32_1 = arith.constant 0 : i32
    return %c0_i32, %c0_i32_0 : i32, i32
  }
  func.func @transform_5(%arg0: i32) -> (i32, i32) {
    %c0_i32 = arith.constant 0 : i32
    %c0_i32_0 = arith.constant 0 : i32
    %c0_i32_1 = arith.constant 0 : i32
    return %c0_i32, %c0_i32_0 : i32, i32
  }
  func.func @transform_6(%arg0: i32) -> (i32, i32) {
    %c0_i32 = arith.constant 0 : i32
    %c0_i32_0 = arith.constant 0 : i32
    %c0_i32_1 = arith.constant 0 : i32
    return %c0_i32, %c0_i32_0 : i32, i32
  }
  func.func @transform_7(%arg0: i32) -> (i32, i32) {
    %c0_i32 = arith.constant 0 : i32
    %c0_i32_0 = arith.constant 0 : i32
    %c0_i32_1 = arith.constant 0 : i32
    return %c0_i32, %c0_i32_0 : i32, i32
  }
  func.func @transform_8(%arg0: i32) -> (i32, i32) {
    %c0_i32 = arith.constant 0 : i32
    %c0_i32_0 = arith.constant 0 : i32
    return %arg0, %c0_i32 : i32, i32
  }
}

</mosaic_0001>

<bundles_post_ra>
// kernel: tpu_custom_call.1
= control target key start
LH: loop header
LB: loop body
LE: loop exit
PB: predicated region body
PF: predicated region fallthrough
CT: control target
= control target key end

     0   :  { %13 = vsyncpa [#allocation3], 0  ;;  %s1075_s0 = inlined_call_operand.vmem [shape: bf16[16,144], index: 0, kind: input, shape index: {}]   ;;  %s1076_s1 = inlined_call_operand.vmem [shape: bf16[16,8], index: 1, kind: input, shape index: {}]   ;;  %s1077_s2 = inlined_call_operand.vmem [shape: f32[16,2], index: 2, kind: input, shape index: {}]   ;;  %s1078_s3 = inlined_call_operand.hbm [shape: bf16[144,128], index: 3, kind: input, shape index: {}]   ;;  %s1079_s4 = inlined_call_operand.vmem [shape: f32[1,128], index: 4, kind: input, shape index: {}]   ;;  %s1080_s5 = inlined_call_operand.hbm [shape: bf16[128,128], index: 5, kind: input, shape index: {}]   ;;  %s1081_s6 = inlined_call_operand.vmem [shape: bf16[8,128], index: 6, kind: input, shape index: {}]   ;;  %s1082_s7 = inlined_call_operand.vmem [shape: f32[1,128], index: 7, kind: input, shape index: {}]   ;;  %s1083_s8 = inlined_call_operand.hbm [shape: f32[16,128], index: 8, kind: output, shape index: {}]  }
   0x1   :  { %14 = vsyncpa [#allocation6], 0 }
   0x2   :  { %15 = vsyncpa [#allocation4], 0  ;;  %s835_s27 = smov [#allocation2]   ;;  %s763_s9 = scalar_lea.hbm %s1078_s3, 1152 }
   0x3   :  { %s27_s28 = sshll.u32 %s835_s27, 4  ;;  %p764_p0 = scmp.ne.s32.totalorder %s1078_s3, %s763_s9  ;;  %s28_s28 = int_to_ptr.vmem [resolvable:$true] %s27_s28 }
   0x4   :  { %p767_p1 = scmp.lt.u32.totalorder %s763_s9, %s1078_s3 }
   0x6   :  { %p769_p2 = pnand %p767_p1, %p764_p0 }
   0x8   :  { %772 = shalt.err (!%p769_p2)
}
   0x9   :  { %s773_s14 = scalar_lea.vmem %s28_s28, 1152  ;;  %p778_p4 = scmp.lt.s32.totalorder %s28_s28, %s28_s28 }
   0xa   :  { %p774_p3 = scmp.ne.s32.totalorder %s28_s28, %s773_s14  ;;  %p779_p5 = scmp.lt.s32.totalorder %s773_s14, %s773_s14 }
   0xc   :  { %p780_p6 = por %p779_p5, %p778_p4 }
   0xe   :  { %p781_p7 = pnand %p780_p6, %p774_p3 }
  0x10   :  { %784 = shalt.err (!%p781_p7)
}
  0x11   :  { %s836_s15 = smov 64   ;;  %s837_s16 = smov 4  }
  0x12   :  { %33 = dma.hbm_to_vmem [thread:$0]  %s1078_s3, 1152, %s28_s28, [#allocation3], %s836_s15, %s836_s15, %s837_s16  }
  0x13   :  { %s838_s19 = smov [#allocation5]   ;;  %s785_s23 = scalar_lea.hbm %s1080_s5, 1024 }
  0x14   :  { %s41_s20 = sshll.u32 %s838_s19, 4  ;;  %p786_p8 = scmp.ne.s32.totalorder %s1080_s5, %s785_s23  ;;  %s42_s20 = int_to_ptr.vmem [resolvable:$true] %s41_s20 }
  0x15   :  { %p789_p9 = scmp.lt.u32.totalorder %s785_s23, %s1080_s5 }
  0x17   :  { %p791_p10 = pnand %p789_p9, %p786_p8 }
  0x19   :  { %794 = shalt.err (!%p791_p10)
}
  0x1a   :  { %s795_s29 = scalar_lea.vmem %s42_s20, 1024  ;;  %p800_p12 = scmp.lt.s32.totalorder %s42_s20, %s42_s20 }
  0x1b   :  { %p796_p11 = scmp.ne.s32.totalorder %s42_s20, %s795_s29  ;;  %p801_p13 = scmp.lt.s32.totalorder %s795_s29, %s795_s29 }
  0x1d   :  { %p802_p0 = por %p801_p13, %p800_p12 }
  0x1f   :  { %p803_p1 = pnand %p802_p0, %p796_p11 }
  0x21   :  { %806 = shalt.err (!%p803_p1)
}
  0x22   :  { %47 = dma.hbm_to_vmem [thread:$0]  %s1080_s5, 1024, %s42_s20, [#allocation6], %s836_s15, %s836_s15, %s837_s16  }
  0x23   :  { %829 = dma.done.wait [#allocation3], 1152  }
  0x24   :  { %830 = vsyncadd [#allocation3], 4294966144 }
  0x25   :  { %831 = dma.done.wait [#allocation6], 1024  }
  0x26   :  { %832 = vsyncadd [#allocation6], 4294966272  ;;  %v839_v0 = vmov 0   ;;  %v840_v1 = vmov 0.0   ;;  %vm841_vm0 = vmmov 0   ;;  %v722_v2 = vld [vmem:[#allocation2] sm:$0xff]  }
  0x27   :  { %153 = vmatprep.subr.bf16.mxu0 %v839_v0  ;;  %622 = vmatprep.subr.bf16.mxu1 %v840_v1  ;;  %v723_v3 = vld [vmem:[#allocation2 + $0x8] sm:$0xff]   ;;  %v724_v4 = vld [vmem:[#allocation2 + $0x10] sm:$0xff]   ;;  %vm255_vm1 = vcmask 1043456   ;;  %v725_v5 = vld [vmem:[#allocation2 + $0x18] sm:$0xff]   ;;  %vm149_vm2 = vcmask 130048   ;;  %vm251_vm3 = vcmask 64512  }
  0x28   :  { %624 = vmatprep.mubr.msk.bf16.mxu1 %vm841_vm0, %v840_v1  ;;  %154 = vmatpush1.bf16.msra.mxu0 %v722_v2  ;;  %v733_v6 = vld [vmem:[%s1075_s0 + $0x4] ss:$8 sps:$4 sm:$0xff]   ;;  %v238_v7 = vld [vmem:[%s1081_s6] sm:$0xf]  ;;  %s842_s6 = smov 1   ;;  %v943_v15 = vld [vmem:[#allocation5 + $0x8] sm:$0xff]  }
  0x29   :  { %155 = vmatprep.subr.bf16.mxu0 %v839_v0  ;;  %v257_v8 = vsel %vm255_vm1, %v238_v7, 0  ;;  %v734_v9 = vld [vmem:[%s1076_s1] sm:$0xff]   ;;  %572 = vmatprep.mubr.msk.bf16.mxu0 %vm149_vm2, %v733_v6  ;;  %v928_v10 = vld [vmem:[#allocation5] sm:$0xff]   ;;  %v950_v16 = vld [vmem:[#allocation5 + $0x10] sm:$0xff]   ;;  %v843_v28 = vmov 1  }
  0x2a   :  { %623 = vmatpush3.bf16.msra.mxu1 %v257_v8  ;;  %v933_v11 = vld [vmem:[%s1077_s2] sm:$0xff]  ;;  %v940_v13 = vld [vmem:[%s1077_s2 + $0x8] sm:$0xff]  ;;  %v728_v17 = vld [vmem:[#allocation2 + $0x30] sm:$0xff]   ;;  %720 = vset.pattern.permute.xlu1 %v843_v28 }
  0x2b   :  { %v726_v12 = vld [vmem:[#allocation2 + $0x20] sm:$0xff]   ;;  %628 = vmatprep.subr.bf16.mxu1 %v840_v1  ;;  %200 = vrot.lane.b32.xlu0 %v933_v11, %s842_s6  ;;  %v727_v14 = vld [vmem:[#allocation2 + $0x28] sm:$0xff]   ;;  %v729_v19 = vld [vmem:[#allocation2 + $0x38] sm:$0xff]  }
  0x2c   :  { %156 = vmatpush1.bf16.msra.mxu0 %v723_v3  ;;  %v954_v18 = vld [vmem:[#allocation5 + $0x18] sm:$0xff]   ;;  %v973_v22 = vld [vmem:[#allocation5 + $0x20] sm:$0xff]   ;;  %v979_v23 = vld [vmem:[#allocation5 + $0x28] sm:$0xff]   ;;  %721 = vset.pattern.permute.xlu0 %v843_v28 }
  0x2d   :  { %157 = vmatprep.subr.bf16.mxu0 %v839_v0  ;;  %625 = vmatmul.mubr.msk.bf16.vlgmr.msra.gmra.mrb[0].mxu1 %vm251_vm3, %v734_v9  ;;  %v730_v20 = vld [vmem:[#allocation2 + $0x40] sm:$0xff]   ;;  %v982_v24 = vld [vmem:[#allocation5 + $0x30] sm:$0xff]  }
  0x2e   :  { %629 = vmatpush3.bf16.msra.mxu1 %v928_v10  ;;  %644 = vmatprep.mubr.msk.bf16.mxu1 %vm841_vm0, %v840_v1  ;;  %v731_v21 = vld [vmem:[%s1075_s0] ss:$8 sps:$4 sm:$0xff]  }
  0x2f   :  { %630 = vmatprep.subr.bf16.mxu1 %v840_v1  ;;  %202 = vrot.lane.b32.xlu0 %v940_v13, %s842_s6  ;;  %v988_v25 = vld [vmem:[#allocation5 + $0x38] sm:$0xff]  }
  0x30   :  { %158 = vmatpush1.bf16.msra.mxu0 %v724_v4  ;;  %v560_v37 = vld [vmem:[%s1079_s4] ss:$0 sm:$0xff] }
  0x31   :  { %159 = vmatprep.subr.bf16.mxu0 %v839_v0  ;;  %v573_v47 = vld [vmem:[%s1082_s7] ss:$0 sm:$0xff]  ;;  %s844_s7 = smov [#allocation7]  }
  0x32   :  { %631 = vmatpush3.bf16.msra.mxu1 %v943_v15  ;;  %s547_s19 = sshll.u32 %s844_s7, 4  ;;  %s548_s19 = int_to_ptr.vmem [resolvable:$true] %s547_s19 }
  0x33   :  { %632 = vmatprep.subr.bf16.mxu1 %v840_v1  ;;  %s807_s20 = scalar_lea.vmem %s548_s19, 256  ;;  %p812_p3 = scmp.lt.s32.totalorder %s548_s19, %s548_s19 }
  0x34   :  { %160 = vmatpush1.bf16.msra.mxu0 %v725_v5  ;;  %p808_p2 = scmp.ne.s32.totalorder %s548_s19, %s807_s20  ;;  %p813_p4 = scmp.lt.s32.totalorder %s807_s20, %s807_s20 }
  0x35   :  { %161 = vmatprep.subr.bf16.mxu0 %v839_v0 }
  0x36   :  { %633 = vmatpush3.bf16.msra.mxu1 %v950_v16  ;;  %p814_p5 = por %p813_p4, %p812_p3 }
  0x37   :  { %634 = vmatprep.subr.bf16.mxu1 %v840_v1 }
  0x38   :  { %162 = vmatpush1.bf16.msra.mxu0 %v726_v12  ;;  %p815_p6 = pnand %p814_p5, %p808_p2 }
  0x39   :  { %163 = vmatprep.subr.bf16.mxu0 %v839_v0 }
  0x3a   :  { %635 = vmatpush3.bf16.msra.mxu1 %v954_v18 }
  0x3b   :  { %636 = vmatprep.subr.bf16.mxu1 %v840_v1 }
  0x3c   :  { %164 = vmatpush1.bf16.msra.mxu0 %v727_v14 }
  0x3d   :  { %165 = vmatprep.subr.bf16.mxu0 %v839_v0 }
  0x3e   :  { %637 = vmatpush3.bf16.msra.mxu1 %v973_v22 }
  0x3f   :  { %638 = vmatprep.subr.bf16.mxu1 %v840_v1 }
  0x40   :  { %166 = vmatpush1.bf16.msra.mxu0 %v728_v17 }
  0x41   :  { %167 = vmatprep.subr.bf16.mxu0 %v839_v0 }
  0x42   :  { %639 = vmatpush3.bf16.msra.mxu1 %v979_v23 }
  0x43   :  { %640 = vmatprep.subr.bf16.mxu1 %v840_v1 }
  0x44   :  { %168 = vmatpush1.bf16.msra.mxu0 %v729_v19 }
  0x45   :  { %169 = vmatprep.subr.bf16.mxu0 %v839_v0 }
  0x46   :  { %641 = vmatpush3.bf16.msra.mxu1 %v982_v24 }
  0x47   :  { %642 = vmatprep.subr.bf16.mxu1 %v840_v1 }
  0x48   :  { %170 = vmatpush1.bf16.msra.mxu0 %v730_v20 }
  0x49   :  { %648 = vmatprep.subr.bf16.mxu0 %v840_v1 }
  0x4a   :  { %643 = vmatpush3.bf16.msra.mxu1 %v988_v25 }
  0x4b   :  { %186 = vmatmul.mubr.bf16.vlgmr.msra.gmra.mrb[0].mxu0 %v731_v21  ;;  %668 = vmatprep.subr.bf16.mxu1 %v840_v1 }
  0x4c   :  { %649 = vmatpush3.bf16.msra.mxu0 %v928_v10  ;;  %664 = vmatprep.mubr.msk.bf16.mxu0 %vm841_vm0, %v840_v1 }
  0x4d   :  { %650 = vmatprep.subr.bf16.mxu0 %v840_v1 }
  0x50   :  { %651 = vmatpush3.bf16.msra.mxu0 %v943_v15 }
  0x51   :  { %652 = vmatprep.subr.bf16.mxu0 %v840_v1 }
  0x54   :  { %653 = vmatpush3.bf16.msra.mxu0 %v950_v16 }
  0x55   :  { %654 = vmatprep.subr.bf16.mxu0 %v840_v1 }
  0x58   :  { %655 = vmatpush3.bf16.msra.mxu0 %v954_v18 }
  0x59   :  { %656 = vmatprep.subr.bf16.mxu0 %v840_v1 }
  0x5c   :  { %657 = vmatpush3.bf16.msra.mxu0 %v973_v22 }
  0x5d   :  { %658 = vmatprep.subr.bf16.mxu0 %v840_v1 }
  0x60   :  { %659 = vmatpush3.bf16.msra.mxu0 %v979_v23 }
  0x61   :  { %660 = vmatprep.subr.bf16.mxu0 %v840_v1 }
  0x64   :  { %661 = vmatpush3.bf16.msra.mxu0 %v982_v24 }
  0x65   :  { %662 = vmatprep.subr.bf16.mxu0 %v840_v1 }
  0x68   :  { %663 = vmatpush3.bf16.msra.mxu0 %v988_v25 }
  0x69   :  { %688 = vmatprep.subr.bf16.mxu0 %v840_v1 }
  0x9d   :  { %v201_v26 = vpop.permute.xlu0 %200 }
  0x9e   :  { %v206_v27 = vsub.f32 %v933_v11, %v201_v26 }
  0xa0   :  { %v208_v29 = vmul.f32 0.25, %v206_v27 }
  0xa1   :  { %v203_v30 = vpop.permute.xlu0 %202 }
  0xa2   :  { %v207_v31 = vsub.f32 %v940_v13, %v203_v30  ;;  %212 = vperm.xlu1 %720, %v208_v29  }
  0xa4   :  { %v209_v32 = vmul.f32 0.25, %v207_v31 }
  0xa6   :  { %217 = vperm.xlu1 %720, %v209_v32  }
 0x100   :  { %v293_v33 = vpop.f32.mrb[0].mxu1 }
 0x101   :  { %v626_v34 = vpop.f32.mrb[1].mxu1  ;;  %v1022_v48 = vadd.f32 %v573_v47, %v293_v33 }
 0x102   :  { %v296_v35 = vpop.f32.mrb[2].mxu1 }
 0x103   :  { %v627_v36 = vpop.f32.mrb[3].mxu1  ;;  %v1024_v50 = vadd.f32 %v573_v47, %v296_v35 }
 0x11e   :  { %v187_v38 = vpop.f32.mrb[0].mxu0 }
 0x11f   :  { %v188_v39 = vadd.f32 %v560_v37, %v187_v38  ;;  %v189_v40 = vpop.f32.mrb[1].mxu0 }
 0x120   :  { %v190_v41 = vpop.f32.mrb[2].mxu0 }
 0x121   :  { %v191_v42 = vadd.f32 %v560_v37, %v190_v41  ;;  %v192_v43 = vpop.f32.mrb[3].mxu0  ;;  %743 = vtanh.f32 %v188_v39  ;;  %v1028_v56 = vpop.permute.xlu1 %212 }
 0x123   :  { %745 = vtanh.f32 %v191_v42 }
 0x125   :  { %v1031_v60 = vpop.permute.xlu1 %217 }
 0x12b   :  { %v744_v44 = vpop.eup %743 }
 0x12d   :  { %v746_v45 = vpop.eup %745 }
 0x12e   :  { %v300_v46 = vpack.c.bf16 %v746_v45, %v744_v44 }
 0x130   :  { %645 = vmatmul.mubr.bf16.vlgmr.msra.gmra.mrb[4].mxu1 %v300_v46 }
 0x131   :  { %669 = vmatpush3.bf16.msra.mxu1 %v928_v10  ;;  %684 = vmatprep.mubr.msk.bf16.mxu1 %vm841_vm0, %v840_v1 }
 0x132   :  { %670 = vmatprep.subr.bf16.mxu1 %v840_v1 }
 0x135   :  { %671 = vmatpush3.bf16.msra.mxu1 %v943_v15 }
 0x136   :  { %672 = vmatprep.subr.bf16.mxu1 %v840_v1 }
 0x139   :  { %673 = vmatpush3.bf16.msra.mxu1 %v950_v16 }
 0x13a   :  { %674 = vmatprep.subr.bf16.mxu1 %v840_v1 }
 0x13d   :  { %675 = vmatpush3.bf16.msra.mxu1 %v954_v18 }
 0x13e   :  { %676 = vmatprep.subr.bf16.mxu1 %v840_v1 }
 0x141   :  { %677 = vmatpush3.bf16.msra.mxu1 %v973_v22 }
 0x142   :  { %678 = vmatprep.subr.bf16.mxu1 %v840_v1 }
 0x145   :  { %679 = vmatpush3.bf16.msra.mxu1 %v979_v23 }
 0x146   :  { %680 = vmatprep.subr.bf16.mxu1 %v840_v1 }
 0x149   :  { %681 = vmatpush3.bf16.msra.mxu1 %v982_v24 }
 0x14a   :  { %682 = vmatprep.subr.bf16.mxu1 %v840_v1 }
 0x14d   :  { %683 = vmatpush3.bf16.msra.mxu1 %v988_v25 }
 0x203   :  { %v383_v49 = vpop.f32.mrb[4].mxu1 }
 0x204   :  { %v384_v51 = vadd.f32 %v383_v49, %v1022_v48  ;;  %v646_v52 = vpop.f32.mrb[5].mxu1 }
 0x205   :  { %v386_v53 = vpop.f32.mrb[6].mxu1 }
 0x206   :  { %747 = vtanh.f32 %v384_v51  ;;  %v387_v54 = vadd.f32 %v386_v53, %v1024_v50  ;;  %v647_v55 = vpop.f32.mrb[7].mxu1 }
 0x208   :  { %749 = vtanh.f32 %v387_v54 }
 0x210   :  { %v748_v57 = vpop.eup %747 }
 0x211   :  { %v392_v58 = vmul.f32 %v748_v57, %v1028_v56 }
 0x212   :  { %v750_v59 = vpop.eup %749 }
 0x213   :  { %v393_v61 = vmul.f32 %v750_v59, %v1031_v60  ;;  %v394_v62 = vadd.f32 %v744_v44, %v392_v58 }
 0x215   :  { %v395_v63 = vadd.f32 %v746_v45, %v393_v61 }
 0x217   :  { %v396_v0 = vpack.c.bf16 %v395_v63, %v394_v62 }
 0x219   :  { %665 = vmatmul.mubr.bf16.vlgmr.msra.gmra.mrb[4].mxu0 %v396_v0 }
 0x21a   :  { %689 = vmatpush3.bf16.msra.mxu0 %v928_v10  ;;  %704 = vmatprep.mubr.msk.bf16.mxu0 %vm841_vm0, %v840_v1 }
 0x21b   :  { %690 = vmatprep.subr.bf16.mxu0 %v840_v1 }
 0x21e   :  { %691 = vmatpush3.bf16.msra.mxu0 %v943_v15 }
 0x21f   :  { %692 = vmatprep.subr.bf16.mxu0 %v840_v1 }
 0x222   :  { %693 = vmatpush3.bf16.msra.mxu0 %v950_v16 }
 0x223   :  { %694 = vmatprep.subr.bf16.mxu0 %v840_v1 }
 0x226   :  { %695 = vmatpush3.bf16.msra.mxu0 %v954_v18 }
 0x227   :  { %696 = vmatprep.subr.bf16.mxu0 %v840_v1 }
 0x22a   :  { %697 = vmatpush3.bf16.msra.mxu0 %v973_v22 }
 0x22b   :  { %698 = vmatprep.subr.bf16.mxu0 %v840_v1 }
 0x22e   :  { %699 = vmatpush3.bf16.msra.mxu0 %v979_v23 }
 0x22f   :  { %700 = vmatprep.subr.bf16.mxu0 %v840_v1 }
 0x232   :  { %701 = vmatpush3.bf16.msra.mxu0 %v982_v24 }
 0x233   :  { %702 = vmatprep.subr.bf16.mxu0 %v840_v1 }
 0x236   :  { %703 = vmatpush3.bf16.msra.mxu0 %v988_v25 }
 0x2ec   :  { %v431_v2 = vpop.f32.mrb[4].mxu0 }
 0x2ed   :  { %v432_v3 = vadd.f32 %v431_v2, %v1022_v48  ;;  %v666_v4 = vpop.f32.mrb[5].mxu0 }
 0x2ee   :  { %v434_v5 = vpop.f32.mrb[6].mxu0 }
 0x2ef   :  { %751 = vtanh.f32 %v432_v3  ;;  %v435_v6 = vadd.f32 %v434_v5, %v1024_v50  ;;  %v667_v7 = vpop.f32.mrb[7].mxu0 }
 0x2f1   :  { %753 = vtanh.f32 %v435_v6 }
 0x2f9   :  { %v752_v8 = vpop.eup %751 }
 0x2fa   :  { %v440_v9 = vmul.f32 %v752_v8, %v1028_v56 }
 0x2fb   :  { %v754_v10 = vpop.eup %753 }
 0x2fc   :  { %v441_v11 = vmul.f32 %v754_v10, %v1031_v60  ;;  %v442_v12 = vadd.f32 %v440_v9, %v394_v62 }
 0x2fe   :  { %v443_v1 = vadd.f32 %v441_v11, %v395_v63 }
 0x300   :  { %v444_v13 = vpack.c.bf16 %v443_v1, %v442_v12 }
 0x302   :  { %685 = vmatmul.mubr.bf16.vlgmr.msra.gmra.mrb[8].mxu1 %v444_v13 }
 0x3d5   :  { %v479_v14 = vpop.f32.mrb[8].mxu1 }
 0x3d6   :  { %v480_v15 = vadd.f32 %v479_v14, %v1022_v48  ;;  %v686_v16 = vpop.f32.mrb[9].mxu1 }
 0x3d7   :  { %v482_v17 = vpop.f32.mrb[10].mxu1 }
 0x3d8   :  { %755 = vtanh.f32 %v480_v15  ;;  %v483_v18 = vadd.f32 %v482_v17, %v1024_v50  ;;  %v687_v19 = vpop.f32.mrb[11].mxu1 }
 0x3da   :  { %757 = vtanh.f32 %v483_v18 }
 0x3e2   :  { %v756_v20 = vpop.eup %755 }
 0x3e3   :  { %v488_v21 = vmul.f32 %v756_v20, %v1028_v56 }
 0x3e4   :  { %v758_v22 = vpop.eup %757 }
 0x3e5   :  { %v489_v23 = vmul.f32 %v758_v22, %v1031_v60  ;;  %v490_v24 = vadd.f32 %v488_v21, %v442_v12 }
 0x3e7   :  { %v491_v25 = vadd.f32 %v489_v23, %v443_v1 }
 0x3e9   :  { %v492_v26 = vpack.c.bf16 %v491_v25, %v490_v24 }
 0x3eb   :  { %705 = vmatmul.mubr.bf16.vlgmr.msra.gmra.mrb[8].mxu0 %v492_v26 }
 0x4be   :  { %v527_v27 = vpop.f32.mrb[8].mxu0 }
 0x4bf   :  { %v528_v28 = vadd.f32 %v527_v27, %v1022_v48  ;;  %v706_v29 = vpop.f32.mrb[9].mxu0 }
 0x4c0   :  { %v530_v30 = vpop.f32.mrb[10].mxu0 }
 0x4c1   :  { %759 = vtanh.f32 %v528_v28  ;;  %v531_v31 = vadd.f32 %v530_v30, %v1024_v50  ;;  %v707_v32 = vpop.f32.mrb[11].mxu0 }
 0x4c3   :  { %761 = vtanh.f32 %v531_v31 }
 0x4cb   :  { %v760_v33 = vpop.eup %759 }
 0x4cc   :  { %v536_v34 = vmul.f32 %v760_v33, %v1028_v56 }
 0x4cd   :  { %v762_v35 = vpop.eup %761 }
 0x4ce   :  { %v537_v36 = vmul.f32 %v762_v35, %v1031_v60  ;;  %v538_v37 = vadd.f32 %v536_v34, %v490_v24 }
 0x4d0   :  { %v539_v38 = vadd.f32 %v537_v36, %v491_v25  ;;  %540 = vst [vmem:[#allocation7] sm:$0xff] %v538_v37 }
 0x4d2   :  { %541 = vst [vmem:[#allocation7 + $0x8] sm:$0xff] %v539_v38 }
 0x4d3   :  { %818 = shalt.err (!%p815_p6)
}
 0x4d4   :  { %s819_s23 = scalar_lea.hbm %s1083_s8, 256 }
 0x4d5   :  { %p820_p7 = scmp.ne.s32.totalorder %s1083_s8, %s819_s23  ;;  %p823_p8 = scmp.lt.u32.totalorder %s819_s23, %s1083_s8 }
 0x4d7   :  { %p825_p9 = pnand %p823_p8, %p820_p7 }
 0x4d9   :  { %828 = shalt.err (!%p825_p9)
}
 0x4da   :  { %s845_s29 = smov 128   ;;  %s846_s3 = smov 8  }
 0x4db   :  { %553 = dma.vmem_to_hbm [thread:$0]  %s548_s19, 256, %s1083_s8, [#allocation4], %s845_s29, %s845_s29, %s846_s3  }
 0x4dc   :  { %833 = dma.done.wait [#allocation4], 256  }
 0x4dd   :  { %834 = vsyncadd [#allocation4], 4294967040 }
 0x4de   :  { %557 = vsyncpa [#allocation3], 1 }
 0x4df   :  { %558 = vsyncpa [#allocation6], 1 }
 0x4e0   :  { %559 = vsyncpa [#allocation4], 1 }

</bundles_post_ra>
